<compile_context>
chip_gen: v6e
topology: v6e:2x2x1
jax: 0.10.0
libtpu: 0.0.40
codegen_flags: <defaults>
</compile_context>

<pallas_src>
import jax
import jax.numpy as jnp
from jax.experimental import pallas as pl
from jax.experimental.pallas import tpu as pltpu

HEAD_PAD = 128  # lane-dense padded width of the fused (v | pi) head output


def actor_critic_kernel(x_ref, w1_ref, b1_ref, w2_ref, b2_ref, wh_ref, bh_ref,
                        out_ref):
    # encoder layer 1: Linear + ReLU   (bf16 MXU matmul, f32 accumulate / VPU)
    x = x_ref[...].astype(jnp.bfloat16)                                # [TB, D]
    h1 = jnp.dot(x, w1_ref[...], preferred_element_type=jnp.float32)   # [TB, H]
    h1 = jnp.maximum(h1 + b1_ref[...], 0.0)
    # encoder layer 2: Linear + ReLU
    h2 = jnp.dot(h1.astype(jnp.bfloat16), w2_ref[...],
                 preferred_element_type=jnp.float32)                   # [TB, H2]
    h2 = jnp.maximum(h2 + b2_ref[...], 0.0)
    # fused (value | policy) head, padded to 128 lanes -> unmasked full stores
    head = jnp.dot(h2.astype(jnp.bfloat16), wh_ref[...],
                   preferred_element_type=jnp.float32) + bh_ref[...]   # [TB,128]
    out_ref[...] = head.astype(out_ref.dtype)                          # bf16 out


# ----------------------------- parameter packing -----------------------------
def init_params(key, input_dim, n_actions, hidden_dim):
    """PyTorch-style uniform(-1/sqrt(fan_in), 1/sqrt(fan_in)) init, deterministic.

    Weights are stored pre-transposed as [fan_in, fan_out]."""
    def linear(k, fan_in, fan_out):
        kw, kb = jax.random.split(k)
        bound = 1.0 / jnp.sqrt(fan_in)
        w = jax.random.uniform(kw, (fan_in, fan_out), jnp.float32, -bound, bound)
        b = jax.random.uniform(kb, (1, fan_out), jnp.float32, -bound, bound)
        return w, b

    k1, k2, k3, k4 = jax.random.split(key, 4)
    h2 = hidden_dim // 2
    w1, b1 = linear(k1, input_dim, hidden_dim)
    w2, b2 = linear(k2, hidden_dim, h2)
    wv, bv = linear(k3, h2, 1)
    wpi, bpi = linear(k4, h2, n_actions)
    return dict(w1=w1, b1=b1, w2=w2, b2=b2, wv=wv, bv=bv, wpi=wpi, bpi=bpi)


def pack_params(params):
    """One-time packing of raw f32 params into the kernel layout.

    Call once after init (and after each weight update) and reuse the result
    across forward calls, so the bf16 casts / concat / pad are NOT
    re-materialized in HBM every RL step."""
    wv, wpi = params["wv"], params["wpi"]
    head_out = wv.shape[1] + wpi.shape[1]            # 1 + n_actions
    assert head_out <= HEAD_PAD, "1 + n_actions must fit in one 128-lane tile"
    wh = jnp.concatenate([wv, wpi], axis=1)                          # [H2, 1+A]
    wh = jnp.pad(wh, ((0, 0), (0, HEAD_PAD - head_out)))
    bh = jnp.concatenate([params["bv"], params["bpi"]], axis=1)
    bh = jnp.pad(bh, ((0, 0), (0, HEAD_PAD - head_out)))             # f32 [1,128]
    return dict(
        w1=params["w1"].astype(jnp.bfloat16),        # [D, H]  bf16 MXU weights
        b1=params["b1"],                             # [1, H]  f32 bias
        w2=params["w2"].astype(jnp.bfloat16),        # [H, H2]
        b2=params["b2"],                             # [1, H2]
        wh=wh.astype(jnp.bfloat16),                  # [H2, 128] fused head
        bh=bh,                                       # [1, 128]  f32
        head_out=head_out,                           # python int (static)
    )


# --------------------------------- forward -----------------------------------
def _round_up(x, m):
    return ((x + m - 1) // m) * m


def _choose_tile_b(b):
    if b <= 512:
        # Single tile; just round the sublane dimension up to a multiple of 8.
        return max(8, _round_up(b, 8))
    # Large batches: big tiles amortize the ~0.35us/step pipeline overhead
    # (matters most on HBM-starved v5e, and on v6e), but keep >= 2 grid steps
    # so dimension_semantics=("parallel",) can shard across v7x's two cores.
    for tile in (1024, 512, 256):
        if _round_up(b, tile) // tile >= 2:
            return tile
    return 256


def actor_critic_forward(state, packed, *, tile_b=None, single_buffer_weights=None):
    """state: [B, input_dim] (f32 or bf16).  packed: dict from pack_params().

    Returns (v [B, 1] f32, pi [B, n_actions] f32)."""
    B, D = state.shape
    w1, b1, w2, b2, wh, bh = (packed[k] for k in ("w1", "b1", "w2", "b2", "wh", "bh"))
    H, H2 = w1.shape[1], w2.shape[1]
    head_out = packed["head_out"]

    if tile_b is None:
        tile_b = _choose_tile_b(B)
    padded_b = _round_up(B, tile_b)
    if padded_b != B:
        # Fallback only: power-of-two / tile-multiple batches never hit this copy.
        state = jnp.pad(state, ((0, padded_b - B), (0, 0)))
    grid = (padded_b // tile_b,)

    weight_bytes = (w1.size * w1.dtype.itemsize + w2.size * w2.dtype.itemsize
                    + wh.size * wh.dtype.itemsize)
    bias_bytes = (b1.size + b2.size + bh.size) * 4
    if single_buffer_weights is None:
        # Only worth the pipeline_mode override when double-buffering the
        # weights would threaten v7x's 64 MiB VMEM.
        single_buffer_weights = weight_bytes > (4 << 20)

    def const_spec(shape):
        # Constant index_map -> operand stays VMEM-resident across batch tiles.
        if single_buffer_weights:
            return pl.BlockSpec(shape, lambda i: (0, 0),
                                pipeline_mode=pl.Buffered(1))
        return pl.BlockSpec(shape, lambda i: (0, 0))

    state_itemsize = state.dtype.itemsize
    cost = pl.CostEstimate(
        flops=2 * padded_b * (D * H + H * H2 + H2 * HEAD_PAD),
        transcendentals=0,
        bytes_accessed=(padded_b * D * state_itemsize        # state in
                        + weight_bytes + bias_bytes          # params
                        + padded_b * HEAD_PAD * 2),          # bf16 out
    )

    weight_bufs = 1 if single_buffer_weights else 2
    est_vmem = (weight_bufs * weight_bytes + 2 * bias_bytes
                + 2 * tile_b * D * state_itemsize            # state double-buffer
                + 2 * tile_b * HEAD_PAD * 2                  # output double-buffer
                + 4 * tile_b * max(H, H2, HEAD_PAD) * 4)     # f32 intermediates
    cp_kwargs = dict(dimension_semantics=("parallel",))
    if est_vmem > (24 << 20):
        # Large-hidden configs: raise the scoped-VMEM default explicitly,
        # capped below v7x's 64 MiB physical VMEM.
        cp_kwargs["vmem_limit_bytes"] = int(min(60 << 20, est_vmem + (2 << 20)))
        # TODO(synk): if a weight set still overflows 60 MiB, add a K-tiling
        # grid axis (marked "arbitrary", last) with an f32 VMEM accumulator.

    out = pl.pallas_call(
        actor_critic_kernel,
        out_shape=jax.ShapeDtypeStruct((padded_b, HEAD_PAD), jnp.bfloat16),
        grid=grid,
        in_specs=[
            pl.BlockSpec((tile_b, D), lambda i: (i, 0)),     # state (streamed)
            const_spec((D, H)),                              # w1 (VMEM-resident)
            const_spec((1, H)),                              # b1
            const_spec((H, H2)),                             # w2
            const_spec((1, H2)),                             # b2
            const_spec((H2, HEAD_PAD)),                      # fused head W
            const_spec((1, HEAD_PAD)),                       # fused head b
        ],
        out_specs=pl.BlockSpec((tile_b, HEAD_PAD), lambda i: (i, 0)),
        compiler_params=pltpu.CompilerParams(**cp_kwargs),
        cost_estimate=cost,
    )(state, w1, b1, w2, b2, wh, bh)

    v = out[:B, :1].astype(jnp.float32)
    pi = out[:B, 1:head_out].astype(jnp.float32)
    return v, pi


# -------------------------------- reference -----------------------------------
def reference_forward(state, p, *, bf16):
    """Pure-JAX reference on the RAW params.  bf16=True mirrors kernel matmul precision."""
    def dot(a, b):
        if bf16:
            a = a.astype(jnp.bfloat16)
            b = b.astype(jnp.bfloat16)
        return jnp.dot(a, b, preferred_element_type=jnp.float32)

    h1 = jnp.maximum(dot(state, p["w1"]) + p["b1"], 0.0)
    h2 = jnp.maximum(dot(h1, p["w2"]) + p["b2"], 0.0)
    return dot(h2, p["wv"]) + p["bv"], dot(h2, p["wpi"]) + p["bpi"]


if __name__ == "__main__":
    input_dim, n_actions, hidden_dim = 16, 4, 32
    batch = 8

    key = jax.random.PRNGKey(0)
    k_params, k_state = jax.random.split(key)
    raw = init_params(k_params, input_dim, n_actions, hidden_dim)
    packed = pack_params(raw)          # one-time packing, reused every step
    state = jax.random.normal(k_state, (batch, input_dim), jnp.float32)

    v, pi = actor_critic_forward(state, packed)
    jax.block_until_ready((v, pi))

    assert v.shape == (batch, 1) and pi.shape == (batch, n_actions)

    # Check vs a reference using the same bf16-operand / f32-accumulate math.
    # (Kernel output itself is bf16-rounded, hence the 2e-2 tolerance.)
    v_bf, pi_bf = reference_forward(state, raw, bf16=True)
    assert jnp.allclose(v, v_bf, atol=2e-2, rtol=2e-2), "value head mismatch (bf16 ref)"
    assert jnp.allclose(pi, pi_bf, atol=2e-2, rtol=2e-2), "policy head mismatch (bf16 ref)"

    # Loose sanity check vs the pure-f32 PyTorch semantics.
    v_f32, pi_f32 = reference_forward(state, raw, bf16=False)
    assert jnp.allclose(v, v_f32, atol=1e-1, rtol=1e-1), "value head drift too large"
    assert jnp.allclose(pi, pi_f32, atol=1e-1, rtol=1e-1), "policy head drift too large"

    print("KERNEL_OK")
</pallas_src>

<mosaic_0001>
module attributes {stable_mosaic.version = 11 : i64} {
  func.func @actor_critic_kernel(%arg0: i32, %arg1: memref<8x16xf32, #tpu.memory_space<vmem>>, %arg2: memref<16x32xbf16, #tpu.memory_space<vmem>>, %arg3: memref<1x32xf32, #tpu.memory_space<vmem>>, %arg4: memref<32x16xbf16, #tpu.memory_space<vmem>>, %arg5: memref<1x16xf32, #tpu.memory_space<vmem>>, %arg6: memref<16x128xbf16, #tpu.memory_space<vmem>>, %arg7: memref<1x128xf32, #tpu.memory_space<vmem>>, %arg8: memref<8x128xbf16, #tpu.memory_space<vmem>>) attributes {dimension_semantics = [#tpu.dimension_semantics<parallel>], iteration_bounds = array<i64: 1>, scalar_prefetch = 0 : i64, scratch_operands = 0 : i64, tpu.core_type = #tpu.core_type<tc>, window_params = [{transform_indices = @transform_0, window_bounds = array<i64: 8, 16>}, {pipeline_mode = #tpu.pipeline_mode<synchronous>, transform_indices = @transform_1, window_bounds = array<i64: 16, 32>}, {pipeline_mode = #tpu.pipeline_mode<synchronous>, transform_indices = @transform_2, window_bounds = array<i64: 1, 32>}, {pipeline_mode = #tpu.pipeline_mode<synchronous>, transform_indices = @transform_3, window_bounds = array<i64: 32, 16>}, {pipeline_mode = #tpu.pipeline_mode<synchronous>, transform_indices = @transform_4, window_bounds = array<i64: 1, 16>}, {pipeline_mode = #tpu.pipeline_mode<synchronous>, transform_indices = @transform_5, window_bounds = array<i64: 16, 128>}, {pipeline_mode = #tpu.pipeline_mode<synchronous>, transform_indices = @transform_6, window_bounds = array<i64: 1, 128>}, {transform_indices = @transform_7, window_bounds = array<i64: 8, 128>}]} {
    %c0 = arith.constant 0 : index
    %c0_0 = arith.constant 0 : index
    %0 = vector.load %arg1[%c0, %c0_0] : memref<8x16xf32, #tpu.memory_space<vmem>>, vector<8x16xf32>
    %1 = arith.truncf %0 : vector<8x16xf32> to vector<8x16xbf16>
    %c0_1 = arith.constant 0 : index
    %c0_2 = arith.constant 0 : index
    %2 = vector.load %arg2[%c0_1, %c0_2] : memref<16x32xbf16, #tpu.memory_space<vmem>>, vector<16x32xbf16>
    %cst = arith.constant dense<0.000000e+00> : vector<8x32xf32>
    %3 = tpu.matmul %1, %2, %cst {dimension_numbers = #tpu.dot_dimension_numbers<[1], [0], [0], [1], [0, 0, 1, 1], [], []>} : vector<8x16xbf16>, vector<16x32xbf16>, vector<8x32xf32> -> vector<8x32xf32>
    %c0_3 = arith.constant 0 : index
    %c0_4 = arith.constant 0 : index
    %4 = vector.load %arg3[%c0_3, %c0_4] : memref<1x32xf32, #tpu.memory_space<vmem>>, vector<1x32xf32>
    %5 = vector.broadcast %4 : vector<1x32xf32> to vector<8x32xf32>
    %6 = arith.addf %3, %5 : vector<8x32xf32>
    %cst_5 = arith.constant 0.000000e+00 : f32
    %7 = vector.broadcast %cst_5 : f32 to vector<8x32xf32>
    %8 = arith.maximumf %6, %7 : vector<8x32xf32>
    %9 = arith.truncf %8 : vector<8x32xf32> to vector<8x32xbf16>
    %c0_6 = arith.constant 0 : index
    %c0_7 = arith.constant 0 : index
    %10 = vector.load %arg4[%c0_6, %c0_7] : memref<32x16xbf16, #tpu.memory_space<vmem>>, vector<32x16xbf16>
    %cst_8 = arith.constant dense<0.000000e+00> : vector<8x16xf32>
    %11 = tpu.matmul %9, %10, %cst_8 {dimension_numbers = #tpu.dot_dimension_numbers<[1], [0], [0], [1], [0, 0, 1, 1], [], []>} : vector<8x32xbf16>, vector<32x16xbf16>, vector<8x16xf32> -> vector<8x16xf32>
    %c0_9 = arith.constant 0 : index
    %c0_10 = arith.constant 0 : index
    %12 = vector.load %arg5[%c0_9, %c0_10] : memref<1x16xf32, #tpu.memory_space<vmem>>, vector<1x16xf32>
    %13 = vector.broadcast %12 : vector<1x16xf32> to vector<8x16xf32>
    %14 = arith.addf %11, %13 : vector<8x16xf32>
    %cst_11 = arith.constant 0.000000e+00 : f32
    %15 = vector.broadcast %cst_11 : f32 to vector<8x16xf32>
    %16 = arith.maximumf %14, %15 : vector<8x16xf32>
    %17 = arith.truncf %16 : vector<8x16xf32> to vector<8x16xbf16>
    %c0_12 = arith.constant 0 : index
    %c0_13 = arith.constant 0 : index
    %18 = vector.load %arg6[%c0_12, %c0_13] : memref<16x128xbf16, #tpu.memory_space<vmem>>, vector<16x128xbf16>
    %cst_14 = arith.constant dense<0.000000e+00> : vector<8x128xf32>
    %19 = tpu.matmul %17, %18, %cst_14 {dimension_numbers = #tpu.dot_dimension_numbers<[1], [0], [0], [1], [0, 0, 1, 1], [], []>} : vector<8x16xbf16>, vector<16x128xbf16>, vector<8x128xf32> -> vector<8x128xf32>
    %c0_15 = arith.constant 0 : index
    %c0_16 = arith.constant 0 : index
    %20 = vector.load %arg7[%c0_15, %c0_16] : memref<1x128xf32, #tpu.memory_space<vmem>>, vector<1x128xf32>
    %21 = vector.broadcast %20 : vector<1x128xf32> to vector<8x128xf32>
    %22 = arith.addf %19, %21 : vector<8x128xf32>
    %23 = arith.truncf %22 : vector<8x128xf32> to vector<8x128xbf16>
    %c0_17 = arith.constant 0 : index
    %c0_18 = arith.constant 0 : index
    %24 = vector.load %arg8[%c0_17, %c0_18] : memref<8x128xbf16, #tpu.memory_space<vmem>>, vector<8x128xbf16>
    tpu.vector_store %arg8[%c0_17, %c0_18], %23 {strides = array<i32>} : memref<8x128xbf16, #tpu.memory_space<vmem>>, vector<8x128xbf16>,
    return
  }
  func.func @transform_0(%arg0: i32) -> (i32, i32) {
    %c0_i32 = arith.constant 0 : i32
    %c0_i32_0 = arith.constant 0 : i32
    return %arg0, %c0_i32 : i32, i32
  }
  func.func @transform_1(%arg0: i32) -> (i32, i32) {
    %c0_i32 = arith.constant 0 : i32
    %c0_i32_0 = arith.constant 0 : i32
    %c0_i32_1 = arith.constant 0 : i32
    return %c0_i32, %c0_i32_0 : i32, i32
  }
  func.func @transform_2(%arg0: i32) -> (i32, i32) {
    %c0_i32 = arith.constant 0 : i32
    %c0_i32_0 = arith.constant 0 : i32
    %c0_i32_1 = arith.constant 0 : i32
    return %c0_i32, %c0_i32_0 : i32, i32
  }
  func.func @transform_3(%arg0: i32) -> (i32, i32) {
    %c0_i32 = arith.constant 0 : i32
    %c0_i32_0 = arith.constant 0 : i32
    %c0_i32_1 = arith.constant 0 : i32
    return %c0_i32, %c0_i32_0 : i32, i32
  }
  func.func @transform_4(%arg0: i32) -> (i32, i32) {
    %c0_i32 = arith.constant 0 : i32
    %c0_i32_0 = arith.constant 0 : i32
    %c0_i32_1 = arith.constant 0 : i32
    return %c0_i32, %c0_i32_0 : i32, i32
  }
  func.func @transform_5(%arg0: i32) -> (i32, i32) {
    %c0_i32 = arith.constant 0 : i32
    %c0_i32_0 = arith.constant 0 : i32
    %c0_i32_1 = arith.constant 0 : i32
    return %c0_i32, %c0_i32_0 : i32, i32
  }
  func.func @transform_6(%arg0: i32) -> (i32, i32) {
    %c0_i32 = arith.constant 0 : i32
    %c0_i32_0 = arith.constant 0 : i32
    %c0_i32_1 = arith.constant 0 : i32
    return %c0_i32, %c0_i32_0 : i32, i32
  }
  func.func @transform_7(%arg0: i32) -> (i32, i32) {
    %c0_i32 = arith.constant 0 : i32
    %c0_i32_0 = arith.constant 0 : i32
    return %arg0, %c0_i32 : i32, i32
  }
}

</mosaic_0001>

<bundles_post_ra>
// kernel: tpu_custom_call.1
= control target key start
LH: loop header
LB: loop body
LE: loop exit
PB: predicated region body
PF: predicated region fallthrough
CT: control target
= control target key end

     0   :  { %v300_v1 = vmov 0.0   ;;  %vm45_vm0 = vcmask 130048   ;;  %vm301_vm1 = vmmov 0   ;;  %s372_s0 = inlined_call_operand.vmem [shape: f32[8,16], index: 0, kind: input, shape index: {}]   ;;  %s373_s1 = inlined_call_operand.vmem [shape: bf16[16,32], index: 1, kind: input, shape index: {}]   ;;  %s374_s2 = inlined_call_operand.vmem [shape: f32[1,32], index: 2, kind: input, shape index: {}]   ;;  %s375_s3 = inlined_call_operand.vmem [shape: bf16[32,16], index: 3, kind: input, shape index: {}]   ;;  %s376_s4 = inlined_call_operand.vmem [shape: f32[1,16], index: 4, kind: input, shape index: {}]   ;;  %s377_s5 = inlined_call_operand.vmem [shape: bf16[16,128], index: 5, kind: input, shape index: {}]   ;;  %s378_s6 = inlined_call_operand.vmem [shape: f32[1,128], index: 6, kind: input, shape index: {}]   ;;  %s379_s7 = inlined_call_operand.hbm [shape: bf16[8,128], index: 7, kind: output, shape index: {}]  }
   0x1   :  { %v274_v0 = vld [vmem:[%s373_s1] sm:$0xff]   ;;  %251 = vmatprep.subr.bf16.mxu0 %v300_v1  ;;  %257 = vmatprep.subr.bf16.mxu1 %v300_v1 }
   0x2   :  { %v28_v2 = vld [vmem:[%s372_s0] sm:$0xff]  ;;  %252 = vmatpush3.bf16.msra.mxu0 %v274_v0  ;;  %253 = vmatprep.mubr.msk.bf16.mxu0 %vm301_vm1, %v300_v1 }
   0x3   :  { %v29_v3 = vpack.c.bf16 %v28_v2, %v28_v2  ;;  %261 = vmatprep.mubr.msk.bf16.mxu1 %vm301_vm1, %v300_v1  ;;  %265 = vmatprep.subr.bf16.mxu0 %v300_v1 }
   0x4   :  { %12 = vsyncpa [#allocation3], 0  ;;  %v275_v4 = vld [vmem:[%s375_s3 + $0x8] sm:$0xff]   ;;  %v276_v5 = vld [vmem:[%s375_s3] sm:$0xff]   ;;  %vm114_vm2 = vcmask 261120   ;;  %s302_s12 = smov [#allocation2]  }
   0x5   :  { %254 = vmatmul.mubr.msk.bf16.vlgmr.msra.gmra.mxu0 %vm45_vm0, %v29_v3  ;;  %258 = vmatpush3.bf16.msra.mxu1 %v275_v4  ;;  %v277_v6 = vld [vmem:[%s377_s5] sm:$0xff]   ;;  %s226_s13 = sshll.u32 %s302_s12, 4  ;;  %s227_s13 = int_to_ptr.vmem [resolvable:$true] %s226_s13 }
   0x6   :  { %267 = vmatprep.mubr.msk.bf16.mxu0 %vm301_vm1, %v300_v1  ;;  %259 = vmatprep.subr.bf16.mxu1 %v300_v1  ;;  %v234_v7 = vld [vmem:[%s374_s2] ss:$0 sm:$0xff]  ;;  %p283_p1 = scmp.lt.s32.totalorder %s227_s13, %s227_s13 }
   0x7   :  { %266 = vmatpush3.bf16.msra.mxu0 %v277_v6  ;;  %v237_v15 = vld [vmem:[%s376_s4] ss:$0 sm:$0xff]  ;;  %s278_s4 = scalar_lea.vmem %s227_s13, 64 }
   0x8   :  { %v241_v23 = vld [vmem:[%s378_s6] ss:$0 sm:$0xff]  ;;  %p279_p0 = scmp.ne.s32.totalorder %s227_s13, %s278_s4  ;;  %p284_p2 = scmp.lt.s32.totalorder %s278_s4, %s278_s4 }
   0x9   :  { %260 = vmatpush3.bf16.msra.mxu1 %v276_v5 }
   0xa   :  { %p285_p3 = por %p284_p2, %p283_p1 }
   0xc   :  { %p286_p4 = pnand %p285_p3, %p279_p0 }
  0xc5   :  { %v83_v8 = vpop.f32.mrf.mxu0 }
  0xc6   :  { %v84_v9 = vadd.f32 %v234_v7, %v83_v8 }
  0xc7   :  { %v255_v10 = vpop.f32.mrf.mxu0 }
  0xc8   :  { %v89_v11 = vmax.f32 %v84_v9, 0.0 }
  0xc9   :  { %v86_v12 = vpop.f32.mrf.mxu0 }
  0xca   :  { %v90_v13 = vpack.c.bf16 %v89_v11, %v89_v11 }
  0xcb   :  { %v256_v14 = vpop.f32.mrf.mxu0 }
  0xcc   :  { %262 = vmatmul.mubr.msk.bf16.vlgmr.msra.gmra.mxu1 %vm114_vm2, %v90_v13 }
 0x18c   :  { %v152_v16 = vpop.f32.mrf.mxu1 }
 0x18d   :  { %v153_v17 = vadd.f32 %v237_v15, %v152_v16 }
 0x18e   :  { %v263_v18 = vpop.f32.mrf.mxu1 }
 0x18f   :  { %v158_v19 = vmax.f32 %v153_v17, 0.0 }
 0x190   :  { %v155_v20 = vpop.f32.mrf.mxu1 }
 0x191   :  { %v159_v21 = vpack.c.bf16 %v158_v19, %v158_v19 }
 0x192   :  { %v264_v22 = vpop.f32.mrf.mxu1 }
 0x193   :  { %268 = vmatmul.mubr.msk.bf16.vlgmr.msra.gmra.mxu0 %vm45_vm0, %v159_v21 }
 0x253   :  { %v212_v24 = vpop.f32.mrf.mxu0 }
 0x254   :  { %v213_v25 = vadd.f32 %v241_v23, %v212_v24 }
 0x255   :  { %v269_v26 = vpop.f32.mrf.mxu0 }
 0x256   :  { %v218_v27 = vpack.c.bf16 %v213_v25, %v213_v25 }
 0x257   :  { %v215_v28 = vpop.f32.mrf.mxu0 }
 0x258   :  { %219 = vst [vmem:[#allocation2] sm:$0xf] %v218_v27 }
 0x259   :  { %v270_v29 = vpop.f32.mrf.mxu0 }
 0x25a   :  { %289 = shalt.err (!%p286_p4)
}
 0x25b   :  { %229 = dma.vmem_to_hbm [thread:$0]  %s227_s13, 64, %s379_s7, [#allocation3]  }
 0x25c   :  { %298 = dma.done.wait [#allocation3], 64  }
 0x25d   :  { %299 = vsyncadd [#allocation3], 4294967232 }
 0x25e   :  { %233 = vsyncpa [#allocation3], 1 }

</bundles_post_ra>
